<compile_context>
chip_gen: v5e
topology: v5e:2x2
jax: 0.10.0
libtpu: 0.0.40
codegen_flags: <defaults>
</compile_context>

<pallas_src>
import functools
import math

import jax
import jax.numpy as jnp
import numpy as np
from jax.experimental import pallas as pl
from jax.experimental.pallas import tpu as pltpu


def _round_up(x, m):
    return ((x + m - 1) // m) * m


def _vmem_capacity_bytes(default=64 << 20):
    try:
        info = pltpu.get_tpu_info()
        return int(getattr(info, "vmem_capacity_bytes", default))
    except Exception:
        return default


def _pick_tile_rows(N, H, WpCin, WcCout, weight_bytes, budget_bytes, in_itemsize):
    """Largest row tile whose fused working set fits `budget_bytes`.

    Counts: double-buffered bf16 input block, double-buffered f32 output block,
    the two f32 row scratches, live (rows, W*C) intermediates, and the
    (conservatively double-buffered) packed weights."""
    in_row = 2 * in_itemsize * WpCin           # double-buffered input block
    out_row = 2 * 4 * WcCout                   # double-buffered f32 output block
    scr_row = 2 * 4 * WpCin                    # xs + hs f32 scratch
    live_row = 4 * WpCin + 4 * 4 * WcCout      # h1/h2 + acc/h3/right/left values
    per_row = in_row + out_row + scr_row + live_row
    fixed = 2 * weight_bytes
    cap = max(1, (budget_bytes - fixed) // per_row)

    # TH must divide H and (TH == H or TH % 8 == 0) so block shapes stay legal.
    cands = [d for d in range(1, H + 1) if H % d == 0 and (d == H or d % 8 == 0)]
    fits = [d for d in cands if d <= cap]
    best = max(fits) if fits else min(cands)

    # Keep at least 2 grid items so v7x's two TensorCores / the input pipeline
    # stay busy (dropped the old blanket ">= 4 steps" rule).
    if N * (H // best) < 2:
        for d in sorted(cands, reverse=True):
            if d <= best and N * (H // d) >= 2:
                best = d
                break
    return best


# ----------------------------------------------------------------------------
# Fused kernel, one (image, row-tile) per grid step.  Layout: rows x (W*C).
#   left  = conv4(bn4(x))                                  (bn4 folded, banded W4)
#   right = conv3(relu(bn3(conv2(relu(bn2(conv1(relu(bn1(x)))))))))
#           conv1 -> block-diag W1, conv2 -> 3 banded dy-tap matmuls W2[dy],
#           conv3 -> block-diag W3;  bn2/bn3 folded into W1/W2.
# ----------------------------------------------------------------------------
def _resunit_kernel(x_ref, s1_ref, t1_ref, w1_ref, b1_ref, w2_ref, b2_ref,
                    w3_ref, b3_ref, w4_ref, b4_ref, o_ref, xs_ref, hs_ref,
                    *, TH, cdt):
    f32 = jnp.float32

    # Unpack the bf16 tile once into an f32 row scratch (rows = TH+2 incl. halo).
    xs_ref[...] = x_ref[0, 0].astype(f32)

    # ---- left branch: conv4(bn4(x)); the banded W4 also selects the centre
    #      (un-padded) columns, so only the centre rows are needed. ----
    left = jnp.dot(xs_ref[1:TH + 1, :].astype(cdt), w4_ref[...],
                   preferred_element_type=f32) + b4_ref[...]

    # ---- right branch: h2 = relu(bn2(conv1(relu(bn1(x))))) on the padded tile ----
    h1 = jnp.maximum(xs_ref[...] * s1_ref[...] + t1_ref[...], 0.0)
    h2 = jnp.dot(h1.astype(cdt), w1_ref[...],
                 preferred_element_type=f32) + b1_ref[...]
    hs_ref[...] = jnp.maximum(h2, 0.0)

    # 3x3 conv2 (+bn3) as 3 banded matmuls over the dy taps (K = Wp*Cin).
    acc = jnp.dot(hs_ref[0:TH, :].astype(cdt), w2_ref[0],
                  preferred_element_type=f32)
    acc = acc + jnp.dot(hs_ref[1:TH + 1, :].astype(cdt), w2_ref[1],
                        preferred_element_type=f32)
    acc = acc + jnp.dot(hs_ref[2:TH + 2, :].astype(cdt), w2_ref[2],
                        preferred_element_type=f32)
    h3 = jnp.maximum(acc + b2_ref[...], 0.0)

    # conv3 (block-diagonal) + residual add; lane-dense (TH, Wc*Cout) store.
    right = jnp.dot(h3.astype(cdt), w3_ref[...],
                    preferred_element_type=f32) + b3_ref[...]
    o_ref[0] = (right + left).astype(o_ref.dtype)


# ----------------------------------------------------------------------------
# Module forward (Pallas path)
# ----------------------------------------------------------------------------
def hrgls_resunit_forward(x_nchw, p, *, tile_rows=None,
                          compute_dtype=jnp.bfloat16, interpret=False):
    x = jnp.transpose(x_nchw, (0, 2, 3, 1)).astype(jnp.float32)   # NCHW -> NHWC
    N, H, W, Cin = x.shape
    Cout = p["w4"].shape[1]
    cdt = compute_dtype
    itemsize = jnp.dtype(cdt).itemsize

    # ---- width alignment: make Wc*Cout a multiple of 128 when cheap ----
    g = 128 // math.gcd(128, Cout)
    Wc = _round_up(W, g)
    if Wc > 2 * _round_up(W, 8):
        Wc = _round_up(W, 8)
    Wp = Wc + 2                       # reflect-padded (and alignment-padded) width
    WpCin, WcCout = Wp * Cin, Wc * Cout

    # ---- fold post-conv BatchNorms into the conv weights/bias (trace time) ----
    s1 = p["scale1"][0].astype(jnp.float32)
    t1 = p["shift1"][0].astype(jnp.float32)
    w1f = (p["w1"] * p["scale2"]).astype(jnp.float32)              # bn2 -> conv1 out
    b1f = (p["b1"] * p["scale2"] + p["shift2"])[0]
    w2f = (p["w2"] * p["scale3"]).astype(jnp.float32)              # bn3 -> conv2 out
    b2f = (p["b2"] * p["scale3"] + p["shift3"])[0]
    w3 = p["w3"].astype(jnp.float32)
    b3 = p["b3"][0]
    w4f = (p["scale4"].reshape(Cin, 1) * p["w4"]).astype(jnp.float32)  # bn4 -> conv4 in
    b4f = (p["shift4"] @ p["w4"] + p["b4"])[0]

    # ---- lane-packed ("banded") weight matrices on the (W*C) axis ----
    # Packed index conventions: padded col = wp*Cin + ci, output col = w*Cout + co.
    # TODO(synk): for large W*Cin/W*Cout (>~2-4K) these banded matrices get too
    # big; switch back to a per-pixel-channel MXU tiling in that regime.
    sel = [jnp.eye(Wp, Wc, k=-dx, dtype=jnp.float32) for dx in range(3)]
    W1big = jnp.kron(jnp.eye(Wp, dtype=jnp.float32), w1f).astype(cdt)      # (WpCin, WpCin)
    W2big = jnp.stack(
        [sum(jnp.kron(sel[dx], w2f[dy, dx]) for dx in range(3))
         for dy in range(3)]).astype(cdt)                                   # (3, WpCin, WcCout)
    W3big = jnp.kron(jnp.eye(Wc, dtype=jnp.float32), w3).astype(cdt)       # (WcCout, WcCout)
    W4big = jnp.kron(sel[1], w4f).astype(cdt)                              # (WpCin, WcCout)

    s1p = jnp.tile(s1, Wp)[None]
    t1p = jnp.tile(t1, Wp)[None]
    b1p = jnp.tile(b1f, Wp)[None]
    b2p = jnp.tile(b2f, Wc)[None]
    b3p = jnp.tile(b3, Wc)[None]
    b4p = jnp.tile(b4f, Wc)[None]

    # ---- reflect-pad W, zero-pad to Wp (garbage cols only feed sliced-away output) ----
    xw = jnp.pad(x, ((0, 0), (0, 0), (1, 1), (0, 0)), mode="reflect")
    xw = jnp.pad(xw, ((0, 0), (0, 0), (0, Wp - (W + 2)), (0, 0)))          # (N, H, Wp, Cin)

    # ---- generation-aware VMEM budget and row-tile choice ----
    vmem_cap = _vmem_capacity_bytes()
    vmem_limit = min(96 << 20, max(32 << 20, vmem_cap * 3 // 4))
    weight_bytes = itemsize * (WpCin * WpCin + 3 * WpCin * WcCout
                               + WcCout * WcCout + WpCin * WcCout)
    TH = tile_rows or _pick_tile_rows(N, H, WpCin, WcCout, weight_bytes,
                                      int(vmem_limit * 0.6), itemsize)
    assert H % TH == 0
    nHb = H // TH

    # ---- pre-tile the rows with a reflected 1-row halo so BlockSpec
    #      auto-pipelining (double-buffered DMA) covers the haloed fetch ----
    row = np.arange(-1, H + 1)
    row = np.where(row < 0, -row, row)
    row = np.where(row >= H, 2 * H - 2 - row, row)                 # reflect over H
    idx = row[np.arange(nHb)[:, None] * TH + np.arange(TH + 2)[None, :]]   # (nHb, TH+2)
    x_tiled = xw[:, jnp.asarray(idx)]                              # (N, nHb, TH+2, Wp, Cin)
    x_tiled = x_tiled.reshape(N, nHb, TH + 2, WpCin).astype(cdt)

    kernel = functools.partial(_resunit_kernel, TH=TH, cdt=cdt)

    def const_spec(a):
        nd = a.ndim
        return pl.BlockSpec(a.shape, lambda n, hb, _nd=nd: (0,) * _nd)

    out = pl.pallas_call(
        kernel,
        out_shape=jax.ShapeDtypeStruct((N, H, WcCout), jnp.float32),
        grid_spec=pltpu.PrefetchScalarGridSpec(
            num_scalar_prefetch=0,
            grid=(N, nHb),
            in_specs=[
                pl.BlockSpec((1, 1, TH + 2, WpCin), lambda n, hb: (n, hb, 0, 0)),
                const_spec(s1p), const_spec(t1p),
                const_spec(W1big), const_spec(b1p),
                const_spec(W2big), const_spec(b2p),
                const_spec(W3big), const_spec(b3p),
                const_spec(W4big), const_spec(b4p),
            ],
            out_specs=pl.BlockSpec((1, TH, WcCout), lambda n, hb: (n, hb, 0)),
            scratch_shapes=[
                pltpu.VMEM((TH + 2, WpCin), jnp.float32),   # x tile (f32 unpacked)
                pltpu.VMEM((TH + 2, WpCin), jnp.float32),   # h2 tile (conv2 input)
            ],
        ),
        compiler_params=pltpu.CompilerParams(
            dimension_semantics=("parallel", "parallel"),
            vmem_limit_bytes=int(vmem_limit),
        ),
        interpret=interpret,
    )(x_tiled, s1p, t1p, W1big, b1p, W2big, b2p, W3big, b3p, W4big, b4p)

    out = out.reshape(N, H, Wc, Cout)[:, :, :W, :]
    return jnp.transpose(out, (0, 3, 1, 2))                        # NHWC -> NCHW
    # TODO(synk): if the surrounding model is NHWC end-to-end, drop the two
    # wrapper transposes (they are a full extra HBM round trip of x / out).


# ----------------------------------------------------------------------------
# Pure-JAX reference (literal PyTorch op order) for validation.
# ----------------------------------------------------------------------------
def _reference_forward(x_nchw, p):
    x = jnp.transpose(x_nchw, (0, 2, 3, 1))

    def bn(h, scale, shift):
        return h * scale[0] + shift[0]

    def conv1x1(h, w, b):
        return jnp.einsum("nhwc,co->nhwo", h, w) + b[0]

    def conv3x3_reflect(h, w, b):
        hp = jnp.pad(h, ((0, 0), (1, 1), (1, 1), (0, 0)), mode="reflect")
        y = jax.lax.conv_general_dilated(
            hp, w, window_strides=(1, 1), padding="VALID",
            dimension_numbers=("NHWC", "HWIO", "NHWC"))
        return y + b[0]

    relu = lambda h: jnp.maximum(h, 0.0)

    left = conv1x1(bn(x, p["scale4"], p["shift4"]), p["w4"], p["b4"])
    right = conv1x1(relu(bn(x, p["scale1"], p["shift1"])), p["w1"], p["b1"])
    right = conv3x3_reflect(relu(bn(right, p["scale2"], p["shift2"])),
                            p["w2"], p["b2"])
    right = conv1x1(relu(bn(right, p["scale3"], p["shift3"])),
                    p["w3"], p["b3"])
    out = right + left
    return jnp.transpose(out, (0, 3, 1, 2))


# ----------------------------------------------------------------------------
# Deterministic parameter initialization (inference-mode BatchNorm pre-folded
# to per-channel scale/shift).
# ----------------------------------------------------------------------------
def _make_bn(key, c, eps=1e-5):
    k1, k2, k3, k4 = jax.random.split(key, 4)
    gamma = 1.0 + 0.1 * jax.random.normal(k1, (c,), jnp.float32)
    beta = 0.1 * jax.random.normal(k2, (c,), jnp.float32)
    mean = 0.1 * jax.random.normal(k3, (c,), jnp.float32)
    var = jax.random.uniform(k4, (c,), jnp.float32, 0.5, 1.5)
    scale = gamma / jnp.sqrt(var + eps)
    shift = beta - mean * scale
    return scale[None, :], shift[None, :]


def init_params(key, cin, cout):
    ks = jax.random.split(key, 12)
    p = {}
    p["scale1"], p["shift1"] = _make_bn(ks[0], cin)
    p["scale2"], p["shift2"] = _make_bn(ks[1], cin)
    p["scale3"], p["shift3"] = _make_bn(ks[2], cout)
    p["scale4"], p["shift4"] = _make_bn(ks[3], cin)
    p["w1"] = 0.2 * jax.random.normal(ks[4], (cin, cin), jnp.float32)         # conv1 1x1
    p["b1"] = 0.1 * jax.random.normal(ks[5], (1, cin), jnp.float32)
    p["w2"] = 0.2 * jax.random.normal(ks[6], (3, 3, cin, cout), jnp.float32)  # conv2 3x3 HWIO
    p["b2"] = 0.1 * jax.random.normal(ks[7], (1, cout), jnp.float32)
    p["w3"] = 0.2 * jax.random.normal(ks[8], (cout, cout), jnp.float32)       # conv3 1x1
    p["b3"] = 0.1 * jax.random.normal(ks[9], (1, cout), jnp.float32)
    p["w4"] = 0.2 * jax.random.normal(ks[10], (cin, cout), jnp.float32)       # conv4 1x1
    p["b4"] = 0.1 * jax.random.normal(ks[11], (1, cout), jnp.float32)
    return p


if __name__ == "__main__":
    N, Cin, Cout, H, W = 2, 4, 8, 16, 16
    key = jax.random.PRNGKey(0)
    kx, kp = jax.random.split(key)
    x = jax.random.normal(kx, (N, Cin, H, W), jnp.float32)   # PyTorch NCHW input
    params = init_params(kp, Cin, Cout)

    out = jax.jit(hrgls_resunit_forward)(x, params)
    out = jax.block_until_ready(out)

    ref = _reference_forward(x, params)
    # bf16 MXU path (f32 accumulate): tolerance loosened from 2e-3 accordingly.
    np.testing.assert_allclose(np.asarray(out), np.asarray(ref),
                               rtol=5e-2, atol=5e-2)
    assert out.shape == (N, Cout, H, W)
    print("KERNEL_OK")
</pallas_src>

<mosaic_0001>
module attributes {stable_mosaic.version = 11 : i64} {
  func.func @_resunit_kernel(%arg0: i32, %arg1: i32, %arg2: memref<1x1x18x72xbf16, #tpu.memory_space<vmem>>, %arg3: memref<1x72xf32, #tpu.memory_space<vmem>>, %arg4: memref<1x72xf32, #tpu.memory_space<vmem>>, %arg5: memref<72x72xbf16, #tpu.memory_space<vmem>>, %arg6: memref<1x72xf32, #tpu.memory_space<vmem>>, %arg7: memref<3x72x128xbf16, #tpu.memory_space<vmem>>, %arg8: memref<1x128xf32, #tpu.memory_space<vmem>>, %arg9: memref<128x128xbf16, #tpu.memory_space<vmem>>, %arg10: memref<1x128xf32, #tpu.memory_space<vmem>>, %arg11: memref<72x128xbf16, #tpu.memory_space<vmem>>, %arg12: memref<1x128xf32, #tpu.memory_space<vmem>>, %arg13: memref<1x16x128xf32, #tpu.memory_space<vmem>>, %arg14: memref<18x72xf32, #tpu.memory_space<vmem>>, %arg15: memref<18x72xf32, #tpu.memory_space<vmem>>) attributes {dimension_semantics = [#tpu.dimension_semantics<parallel>, #tpu.dimension_semantics<parallel>], iteration_bounds = array<i64: 2, 1>, scalar_prefetch = 0 : i64, scratch_operands = 2 : i64, tpu.core_type = #tpu.core_type<tc>, window_params = [{transform_indices = @transform_0, window_bounds = array<i64: 1, 1, 18, 72>}, {pipeline_mode = #tpu.pipeline_mode<synchronous>, transform_indices = @transform_1, window_bounds = array<i64: 1, 72>}, {pipeline_mode = #tpu.pipeline_mode<synchronous>, transform_indices = @transform_2, window_bounds = array<i64: 1, 72>}, {pipeline_mode = #tpu.pipeline_mode<synchronous>, transform_indices = @transform_3, window_bounds = array<i64: 72, 72>}, {pipeline_mode = #tpu.pipeline_mode<synchronous>, transform_indices = @transform_4, window_bounds = array<i64: 1, 72>}, {pipeline_mode = #tpu.pipeline_mode<synchronous>, transform_indices = @transform_5, window_bounds = array<i64: 3, 72, 128>}, {pipeline_mode = #tpu.pipeline_mode<synchronous>, transform_indices = @transform_6, window_bounds = array<i64: 1, 128>}, {pipeline_mode = #tpu.pipeline_mode<synchronous>, transform_indices = @transform_7, window_bounds = array<i64: 128, 128>}, {pipeline_mode = #tpu.pipeline_mode<synchronous>, transform_indices = @transform_8, window_bounds = array<i64: 1, 128>}, {pipeline_mode = #tpu.pipeline_mode<synchronous>, transform_indices = @transform_9, window_bounds = array<i64: 72, 128>}, {pipeline_mode = #tpu.pipeline_mode<synchronous>, transform_indices = @transform_10, window_bounds = array<i64: 1, 128>}, {transform_indices = @transform_11, window_bounds = array<i64: 1, 16, 128>}]} {
    %c0 = arith.constant 0 : index
    %c0_0 = arith.constant 0 : index
    %c0_1 = arith.constant 0 : index
    %c0_2 = arith.constant 0 : index
    %0 = vector.load %arg2[%c0, %c0_0, %c0_1, %c0_2] : memref<1x1x18x72xbf16, #tpu.memory_space<vmem>>, vector<1x1x18x72xbf16>
    %1 = vector.shape_cast %0 : vector<1x1x18x72xbf16> to vector<18x72xbf16>
    %2 = arith.extf %1 : vector<18x72xbf16> to vector<18x72xf32>
    %c0_3 = arith.constant 0 : index
    %c0_4 = arith.constant 0 : index
    %3 = vector.load %arg14[%c0_3, %c0_4] : memref<18x72xf32, #tpu.memory_space<vmem>>, vector<18x72xf32>
    tpu.vector_store %arg14[%c0_3, %c0_4], %2 {strides = array<i32>} : memref<18x72xf32, #tpu.memory_space<vmem>>, vector<18x72xf32>,
    %c1 = arith.constant 1 : index
    %c0_5 = arith.constant 0 : index
    %4 = vector.load %arg14[%c1, %c0_5] : memref<18x72xf32, #tpu.memory_space<vmem>>, vector<16x72xf32>
    %5 = arith.truncf %4 : vector<16x72xf32> to vector<16x72xbf16>
    %c0_6 = arith.constant 0 : index
    %c0_7 = arith.constant 0 : index
    %6 = vector.load %arg11[%c0_6, %c0_7] : memref<72x128xbf16, #tpu.memory_space<vmem>>, vector<72x128xbf16>
    %cst = arith.constant dense<0.000000e+00> : vector<16x128xf32>
    %7 = tpu.matmul %5, %6, %cst {dimension_numbers = #tpu.dot_dimension_numbers<[1], [0], [0], [1], [0, 0, 1, 1], [], []>} : vector<16x72xbf16>, vector<72x128xbf16>, vector<16x128xf32> -> vector<16x128xf32>
    %c0_8 = arith.constant 0 : index
    %c0_9 = arith.constant 0 : index
    %8 = vector.load %arg12[%c0_8, %c0_9] : memref<1x128xf32, #tpu.memory_space<vmem>>, vector<1x128xf32>
    %9 = vector.broadcast %8 : vector<1x128xf32> to vector<16x128xf32>
    %10 = arith.addf %7, %9 : vector<16x128xf32>
    %c0_10 = arith.constant 0 : index
    %c0_11 = arith.constant 0 : index
    %11 = vector.load %arg14[%c0_10, %c0_11] : memref<18x72xf32, #tpu.memory_space<vmem>>, vector<18x72xf32>
    %c0_12 = arith.constant 0 : index
    %c0_13 = arith.constant 0 : index
    %12 = vector.load %arg3[%c0_12, %c0_13] : memref<1x72xf32, #tpu.memory_space<vmem>>, vector<1x72xf32>
    %13 = vector.broadcast %12 : vector<1x72xf32> to vector<18x72xf32>
    %14 = arith.mulf %11, %13 : vector<18x72xf32>
    %c0_14 = arith.constant 0 : index
    %c0_15 = arith.constant 0 : index
    %15 = vector.load %arg4[%c0_14, %c0_15] : memref<1x72xf32, #tpu.memory_space<vmem>>, vector<1x72xf32>
    %16 = vector.broadcast %15 : vector<1x72xf32> to vector<18x72xf32>
    %17 = arith.addf %14, %16 : vector<18x72xf32>
    %cst_16 = arith.constant 0.000000e+00 : f32
    %18 = vector.broadcast %cst_16 : f32 to vector<18x72xf32>
    %19 = arith.maximumf %17, %18 : vector<18x72xf32>
    %20 = arith.truncf %19 : vector<18x72xf32> to vector<18x72xbf16>
    %c0_17 = arith.constant 0 : index
    %c0_18 = arith.constant 0 : index
    %21 = vector.load %arg5[%c0_17, %c0_18] : memref<72x72xbf16, #tpu.memory_space<vmem>>, vector<72x72xbf16>
    %cst_19 = arith.constant dense<0.000000e+00> : vector<18x72xf32>
    %22 = tpu.matmul %20, %21, %cst_19 {dimension_numbers = #tpu.dot_dimension_numbers<[1], [0], [0], [1], [0, 0, 1, 1], [], []>} : vector<18x72xbf16>, vector<72x72xbf16>, vector<18x72xf32> -> vector<18x72xf32>
    %c0_20 = arith.constant 0 : index
    %c0_21 = arith.constant 0 : index
    %23 = vector.load %arg6[%c0_20, %c0_21] : memref<1x72xf32, #tpu.memory_space<vmem>>, vector<1x72xf32>
    %24 = vector.broadcast %23 : vector<1x72xf32> to vector<18x72xf32>
    %25 = arith.addf %22, %24 : vector<18x72xf32>
    %cst_22 = arith.constant 0.000000e+00 : f32
    %26 = vector.broadcast %cst_22 : f32 to vector<18x72xf32>
    %27 = arith.maximumf %25, %26 : vector<18x72xf32>
    %c0_23 = arith.constant 0 : index
    %c0_24 = arith.constant 0 : index
    %28 = vector.load %arg15[%c0_23, %c0_24] : memref<18x72xf32, #tpu.memory_space<vmem>>, vector<18x72xf32>
    tpu.vector_store %arg15[%c0_23, %c0_24], %27 {strides = array<i32>} : memref<18x72xf32, #tpu.memory_space<vmem>>, vector<18x72xf32>,
    %c0_25 = arith.constant 0 : index
    %c0_26 = arith.constant 0 : index
    %29 = vector.load %arg15[%c0_25, %c0_26] : memref<18x72xf32, #tpu.memory_space<vmem>>, vector<16x72xf32>
    %30 = arith.truncf %29 : vector<16x72xf32> to vector<16x72xbf16>
    %c0_27 = arith.constant 0 : index
    %c0_28 = arith.constant 0 : index
    %c0_29 = arith.constant 0 : index
    %31 = vector.load %arg7[%c0_27, %c0_28, %c0_29] : memref<3x72x128xbf16, #tpu.memory_space<vmem>>, vector<1x72x128xbf16>
    %32 = vector.shape_cast %31 : vector<1x72x128xbf16> to vector<72x128xbf16>
    %cst_30 = arith.constant dense<0.000000e+00> : vector<16x128xf32>
    %33 = tpu.matmul %30, %32, %cst_30 {dimension_numbers = #tpu.dot_dimension_numbers<[1], [0], [0], [1], [0, 0, 1, 1], [], []>} : vector<16x72xbf16>, vector<72x128xbf16>, vector<16x128xf32> -> vector<16x128xf32>
    %c1_31 = arith.constant 1 : index
    %c0_32 = arith.constant 0 : index
    %34 = vector.load %arg15[%c1_31, %c0_32] : memref<18x72xf32, #tpu.memory_space<vmem>>, vector<16x72xf32>
    %35 = arith.truncf %34 : vector<16x72xf32> to vector<16x72xbf16>
    %c1_33 = arith.constant 1 : index
    %c0_34 = arith.constant 0 : index
    %c0_35 = arith.constant 0 : index
    %36 = vector.load %arg7[%c1_33, %c0_34, %c0_35] : memref<3x72x128xbf16, #tpu.memory_space<vmem>>, vector<1x72x128xbf16>
    %37 = vector.shape_cast %36 : vector<1x72x128xbf16> to vector<72x128xbf16>
    %cst_36 = arith.constant dense<0.000000e+00> : vector<16x128xf32>
    %38 = tpu.matmul %35, %37, %cst_36 {dimension_numbers = #tpu.dot_dimension_numbers<[1], [0], [0], [1], [0, 0, 1, 1], [], []>} : vector<16x72xbf16>, vector<72x128xbf16>, vector<16x128xf32> -> vector<16x128xf32>
    %39 = arith.addf %33, %38 : vector<16x128xf32>
    %c2 = arith.constant 2 : index
    %c0_37 = arith.constant 0 : index
    %40 = vector.load %arg15[%c2, %c0_37] : memref<18x72xf32, #tpu.memory_space<vmem>>, vector<16x72xf32>
    %41 = arith.truncf %40 : vector<16x72xf32> to vector<16x72xbf16>
    %c2_38 = arith.constant 2 : index
    %c0_39 = arith.constant 0 : index
    %c0_40 = arith.constant 0 : index
    %42 = vector.load %arg7[%c2_38, %c0_39, %c0_40] : memref<3x72x128xbf16, #tpu.memory_space<vmem>>, vector<1x72x128xbf16>
    %43 = vector.shape_cast %42 : vector<1x72x128xbf16> to vector<72x128xbf16>
    %cst_41 = arith.constant dense<0.000000e+00> : vector<16x128xf32>
    %44 = tpu.matmul %41, %43, %cst_41 {dimension_numbers = #tpu.dot_dimension_numbers<[1], [0], [0], [1], [0, 0, 1, 1], [], []>} : vector<16x72xbf16>, vector<72x128xbf16>, vector<16x128xf32> -> vector<16x128xf32>
    %45 = arith.addf %39, %44 : vector<16x128xf32>
    %c0_42 = arith.constant 0 : index
    %c0_43 = arith.constant 0 : index
    %46 = vector.load %arg8[%c0_42, %c0_43] : memref<1x128xf32, #tpu.memory_space<vmem>>, vector<1x128xf32>
    %47 = vector.broadcast %46 : vector<1x128xf32> to vector<16x128xf32>
    %48 = arith.addf %45, %47 : vector<16x128xf32>
    %cst_44 = arith.constant 0.000000e+00 : f32
    %49 = vector.broadcast %cst_44 : f32 to vector<16x128xf32>
    %50 = arith.maximumf %48, %49 : vector<16x128xf32>
    %51 = arith.truncf %50 : vector<16x128xf32> to vector<16x128xbf16>
    %c0_45 = arith.constant 0 : index
    %c0_46 = arith.constant 0 : index
    %52 = vector.load %arg9[%c0_45, %c0_46] : memref<128x128xbf16, #tpu.memory_space<vmem>>, vector<128x128xbf16>
    %cst_47 = arith.constant dense<0.000000e+00> : vector<16x128xf32>
    %53 = tpu.matmul %51, %52, %cst_47 {dimension_numbers = #tpu.dot_dimension_numbers<[1], [0], [0], [1], [0, 0, 1, 1], [], []>} : vector<16x128xbf16>, vector<128x128xbf16>, vector<16x128xf32> -> vector<16x128xf32>
    %c0_48 = arith.constant 0 : index
    %c0_49 = arith.constant 0 : index
    %54 = vector.load %arg10[%c0_48, %c0_49] : memref<1x128xf32, #tpu.memory_space<vmem>>, vector<1x128xf32>
    %55 = vector.broadcast %54 : vector<1x128xf32> to vector<16x128xf32>
    %56 = arith.addf %53, %55 : vector<16x128xf32>
    %57 = arith.addf %56, %10 : vector<16x128xf32>
    %c0_50 = arith.constant 0 : index
    %c0_51 = arith.constant 0 : index
    %c0_52 = arith.constant 0 : index
    %58 = vector.load %arg13[%c0_50, %c0_51, %c0_52] : memref<1x16x128xf32, #tpu.memory_space<vmem>>, vector<1x16x128xf32>
    %59 = vector.shape_cast %58 : vector<1x16x128xf32> to vector<16x128xf32>
    %60 = vector.shape_cast %57 : vector<16x128xf32> to vector<1x16x128xf32>
    tpu.vector_store %arg13[%c0_50, %c0_51, %c0_52], %60 {strides = array<i32>} : memref<1x16x128xf32, #tpu.memory_space<vmem>>, vector<1x16x128xf32>,
    return
  }
  func.func @transform_0(%arg0: i32, %arg1: i32) -> (i32, i32, i32, i32) {
    %c0_i32 = arith.constant 0 : i32
    %c0_i32_0 = arith.constant 0 : i32
    %c0_i32_1 = arith.constant 0 : i32
    return %arg0, %arg1, %c0_i32, %c0_i32_0 : i32, i32, i32, i32
  }
  func.func @transform_1(%arg0: i32, %arg1: i32) -> (i32, i32) {
    %c0_i32 = arith.constant 0 : i32
    %c0_i32_0 = arith.constant 0 : i32
    %c0_i32_1 = arith.constant 0 : i32
    return %c0_i32, %c0_i32_0 : i32, i32
  }
  func.func @transform_2(%arg0: i32, %arg1: i32) -> (i32, i32) {
    %c0_i32 = arith.constant 0 : i32
    %c0_i32_0 = arith.constant 0 : i32
    %c0_i32_1 = arith.constant 0 : i32
    return %c0_i32, %c0_i32_0 : i32, i32
  }
  func.func @transform_3(%arg0: i32, %arg1: i32) -> (i32, i32) {
    %c0_i32 = arith.constant 0 : i32
    %c0_i32_0 = arith.constant 0 : i32
    %c0_i32_1 = arith.constant 0 : i32
    return %c0_i32, %c0_i32_0 : i32, i32
  }
  func.func @transform_4(%arg0: i32, %arg1: i32) -> (i32, i32) {
    %c0_i32 = arith.constant 0 : i32
    %c0_i32_0 = arith.constant 0 : i32
    %c0_i32_1 = arith.constant 0 : i32
    return %c0_i32, %c0_i32_0 : i32, i32
  }
  func.func @transform_5(%arg0: i32, %arg1: i32) -> (i32, i32, i32) {
    %c0_i32 = arith.constant 0 : i32
    %c0_i32_0 = arith.constant 0 : i32
    %c0_i32_1 = arith.constant 0 : i32
    %c0_i32_2 = arith.constant 0 : i32
    return %c0_i32, %c0_i32_0, %c0_i32_1 : i32, i32, i32
  }
  func.func @transform_6(%arg0: i32, %arg1: i32) -> (i32, i32) {
    %c0_i32 = arith.constant 0 : i32
    %c0_i32_0 = arith.constant 0 : i32
    %c0_i32_1 = arith.constant 0 : i32
    return %c0_i32, %c0_i32_0 : i32, i32
  }
  func.func @transform_7(%arg0: i32, %arg1: i32) -> (i32, i32) {
    %c0_i32 = arith.constant 0 : i32
    %c0_i32_0 = arith.constant 0 : i32
    %c0_i32_1 = arith.constant 0 : i32
    return %c0_i32, %c0_i32_0 : i32, i32
  }
  func.func @transform_8(%arg0: i32, %arg1: i32) -> (i32, i32) {
    %c0_i32 = arith.constant 0 : i32
    %c0_i32_0 = arith.constant 0 : i32
    %c0_i32_1 = arith.constant 0 : i32
    return %c0_i32, %c0_i32_0 : i32, i32
  }
  func.func @transform_9(%arg0: i32, %arg1: i32) -> (i32, i32) {
    %c0_i32 = arith.constant 0 : i32
    %c0_i32_0 = arith.constant 0 : i32
    %c0_i32_1 = arith.constant 0 : i32
    return %c0_i32, %c0_i32_0 : i32, i32
  }
  func.func @transform_10(%arg0: i32, %arg1: i32) -> (i32, i32) {
    %c0_i32 = arith.constant 0 : i32
    %c0_i32_0 = arith.constant 0 : i32
    %c0_i32_1 = arith.constant 0 : i32
    return %c0_i32, %c0_i32_0 : i32, i32
  }
  func.func @transform_11(%arg0: i32, %arg1: i32) -> (i32, i32, i32) {
    %c0_i32 = arith.constant 0 : i32
    %c0_i32_0 = arith.constant 0 : i32
    return %arg0, %arg1, %c0_i32 : i32, i32, i32
  }
}

</mosaic_0001>

<bundles_post_ra>
// kernel: tile.46
= control target key start
LH: loop header
LB: loop body
LE: loop exit
PB: predicated region body
PF: predicated region fallthrough
CT: control target
= control target key end

     0   :  { %s28_s0 = inlined_call_operand.vmem [shape: f32[8], index: 0, kind: input, shape index: {}]   ;;  %s29_s1 = inlined_call_operand.vmem [shape: f32[16,8], index: 1, kind: output, shape index: {}]  }
   0x1   :  { %v4_v0 = vld [vmem:[%s28_s0] ss:$0 sm:$0xff] }
   0x2   :  { %5 = vst [vmem:[%s29_s1] sm:$0xff] %v4_v0 }
   0x3   :  { %8 = vst [vmem:[%s29_s1 + $0x8] sm:$0xff] %v4_v0 }

// kernel: tile.47
= control target key start
LH: loop header
LB: loop body
LE: loop exit
PB: predicated region body
PF: predicated region fallthrough
CT: control target
= control target key end

     0   :  { %s131_s10 = smov 120   ;;  %s132_s11 = smov 104   ;;  %vm3_vm0 = vcmask 64512   ;;  %vm9_vm1 = vcmask 1048512   ;;  %vm15_vm2 = vcmask 982912   ;;  %vm21_vm3 = vcmask 917312   ;;  %s207_s0 = inlined_call_operand.vmem [shape: f32[16,8], index: 0, kind: input, shape index: {}]   ;;  %s208_s1 = inlined_call_operand.vmem [shape: f32[1,128], index: 1, kind: output, shape index: {}]  }
   0x1   :  { %v101_v0 = vld [vmem:[%s207_s0 + $0xf] sm:$0x1]   ;;  %v103_v1 = vld [vmem:[%s207_s0 + $0xd] sm:$0x1]   ;;  %v105_v2 = vld [vmem:[%s207_s0 + $0xb] sm:$0x1]  }
   0x2   :  { %7 = vrot.lane.b32.xlu0 %v101_v0, %s131_s10  ;;  %19 = vrot.lane.b32.xlu1 %v103_v1, %s132_s11  ;;  %s133_s14 = smov 88   ;;  %v102_v3 = vld [vmem:[%s207_s0 + $0xe] sm:$0x1]   ;;  %v104_v4 = vld [vmem:[%s207_s0 + $0xc] sm:$0x1]   ;;  %s134_s19 = smov 112  }
   0x3   :  { %31 = vrot.lane.b32.xlu2 %v105_v2, %s133_s14  ;;  %s135_s20 = smov 96   ;;  %v106_v5 = vld [vmem:[%s207_s0 + $0xa] sm:$0x1]   ;;  %s136_s23 = smov 80   ;;  %v107_v6 = vld [vmem:[%s207_s0 + $0x9] sm:$0x1]  }
   0x4   :  { %v108_v7 = vld [vmem:[%s207_s0 + $0x8] sm:$0x1]   ;;  %s137_s28 = smov 72   ;;  %s138_s29 = smov 64   ;;  %v109_v8 = vld [vmem:[%s207_s0 + $0x7] sm:$0x1]  }
   0x5   :  { %s139_s3 = smov 56   ;;  %v110_v9 = vld [vmem:[%s207_s0 + $0x6] sm:$0x1]   ;;  %v111_v10 = vld [vmem:[%s207_s0 + $0x5] sm:$0x1]   ;;  %s140_s8 = smov 48  }
   0x6   :  { %s141_s9 = smov 40   ;;  %v112_v11 = vld [vmem:[%s207_s0 + $0x4] sm:$0x1]   ;;  %s142_s12 = smov 32   ;;  %v113_v12 = vld [vmem:[%s207_s0 + $0x3] sm:$0x1]  }
   0x7   :  { %v114_v13 = vld [vmem:[%s207_s0 + $0x2] sm:$0x1]   ;;  %s143_s17 = smov 24   ;;  %s144_s18 = smov 16   ;;  %v115_v14 = vld [vmem:[%s207_s0 + $0x1] sm:$0x1]  }
   0x8   :  { %s145_s21 = smov 8   ;;  %v2_v15 = vld [vmem:[%s207_s0] sm:$0x1]   ;;  %vm27_vm4 = vcmask 851712   ;;  %vm33_vm5 = vcmask 786112   ;;  %vm39_vm6 = vcmask 720512  }
   0x9   :  { %4 = vst.msk [vmem:[#allocation0] sm:$0x1] %vm3_vm0, %v2_v15   ;;  %vm45_vm7 = vcmask 654912   ;;  %vm51_vm8 = vcmask 589312   ;;  %vm57_vm9 = vcmask 523712   ;;  %vm63_vm10 = vcmask 458112  }
   0xa   :  { %13 = vrot.lane.b32.xlu0 %v102_v3, %s134_s19  ;;  %25 = vrot.lane.b32.xlu1 %v104_v4, %s135_s20  ;;  %vm69_vm11 = vcmask 392512   ;;  %vm75_vm12 = vcmask 326912   ;;  %vm81_vm13 = vcmask 261312   ;;  %vm87_vm14 = vcmask 195712  }
   0xb   :  { %37 = vrot.lane.b32.xlu2 %v106_v5, %s136_s23  ;;  %vm93_vm15 = vcmask 130112  }
  0x12   :  { %43 = vrot.lane.b32.xlu0 %v107_v6, %s137_s28  ;;  %49 = vrot.lane.b32.xlu1 %v108_v7, %s138_s29 }
  0x13   :  { %55 = vrot.lane.b32.xlu2 %v109_v8, %s139_s3 }
  0x1a   :  { %61 = vrot.lane.b32.xlu0 %v110_v9, %s140_s8  ;;  %67 = vrot.lane.b32.xlu1 %v111_v10, %s141_s9 }
  0x1b   :  { %73 = vrot.lane.b32.xlu2 %v112_v11, %s142_s12 }
  0x22   :  { %79 = vrot.lane.b32.xlu0 %v113_v12, %s143_s17  ;;  %85 = vrot.lane.b32.xlu1 %v114_v13, %s144_s18 }
  0x23   :  { %91 = vrot.lane.b32.xlu2 %v115_v14, %s145_s21 }
  0x5d   :  { %v32_v16 = vpop.permute.xlu2 %31  }
  0x65   :  { %v38_v17 = vpop.permute.xlu2 %37  }
  0x6d   :  { %v56_v18 = vpop.permute.xlu2 %55  }
  0x74   :  { %v8_v19 = vpop.permute.xlu0 %7   ;;  %v20_v20 = vpop.permute.xlu1 %19  }
  0x75   :  { %10 = vst.msk [vmem:[#allocation0] sm:$0x1] %vm9_vm1, %v8_v19   ;;  %v74_v21 = vpop.permute.xlu2 %73  }
  0x7c   :  { %v14_v22 = vpop.permute.xlu0 %13   ;;  %v26_v23 = vpop.permute.xlu1 %25  }
  0x7d   :  { %16 = vst.msk [vmem:[#allocation0] sm:$0x1] %vm15_vm2, %v14_v22   ;;  %v92_v24 = vpop.permute.xlu2 %91  }
  0x7e   :  { %22 = vst.msk [vmem:[#allocation0] sm:$0x1] %vm21_vm3, %v20_v20  }
  0x7f   :  { %28 = vst.msk [vmem:[#allocation0] sm:$0x1] %vm27_vm4, %v26_v23  }
  0x80   :  { %34 = vst.msk [vmem:[#allocation0] sm:$0x1] %vm33_vm5, %v32_v16  }
  0x81   :  { %40 = vst.msk [vmem:[#allocation0] sm:$0x1] %vm39_vm6, %v38_v17  }
  0x84   :  { %v44_v25 = vpop.permute.xlu0 %43   ;;  %v50_v26 = vpop.permute.xlu1 %49  }
  0x85   :  { %46 = vst.msk [vmem:[#allocation0] sm:$0x1] %vm45_vm7, %v44_v25  }
  0x86   :  { %52 = vst.msk [vmem:[#allocation0] sm:$0x1] %vm51_vm8, %v50_v26  }
  0x87   :  { %58 = vst.msk [vmem:[#allocation0] sm:$0x1] %vm57_vm9, %v56_v18  }
  0x8c   :  { %v62_v27 = vpop.permute.xlu0 %61   ;;  %v68_v28 = vpop.permute.xlu1 %67  }
  0x8d   :  { %64 = vst.msk [vmem:[#allocation0] sm:$0x1] %vm63_vm10, %v62_v27  }
  0x8e   :  { %70 = vst.msk [vmem:[#allocation0] sm:$0x1] %vm69_vm11, %v68_v28  }
  0x8f   :  { %76 = vst.msk [vmem:[#allocation0] sm:$0x1] %vm75_vm12, %v74_v21  }
  0x94   :  { %v80_v29 = vpop.permute.xlu0 %79   ;;  %v86_v30 = vpop.permute.xlu1 %85  }
  0x95   :  { %82 = vst.msk [vmem:[#allocation0] sm:$0x1] %vm81_vm13, %v80_v29  }
  0x96   :  { %88 = vst.msk [vmem:[#allocation0] sm:$0x1] %vm87_vm14, %v86_v30  }
  0x97   :  { %94 = vst.msk [vmem:[#allocation0] sm:$0x1] %vm93_vm15, %v92_v24  }
  0x9e   :  { %v97_v31 = vld [vmem:[#allocation0] sm:$0x1] }
  0x9f   :  { %100 = vst [vmem:[%s208_s1] sm:$0x1] %v97_v31 }

// kernel: tile.34
= control target key start
LH: loop header
LB: loop body
LE: loop exit
PB: predicated region body
PF: predicated region fallthrough
CT: control target
= control target key end

     0   :  { %s34_s0 = inlined_call_operand.vmem [shape: f32[4], index: 0, kind: input, shape index: {}]   ;;  %s35_s1 = inlined_call_operand.vmem [shape: f32[18,4], index: 1, kind: output, shape index: {}]  }
   0x1   :  { %v4_v0 = vld [vmem:[%s34_s0] ss:$0 sm:$0xff] }
   0x2   :  { %5 = vst [vmem:[%s35_s1] sm:$0xff] %v4_v0 }
   0x3   :  { %10 = vst [vmem:[%s35_s1 + $0x8] sm:$0xff] %v4_v0 }
   0x4   :  { %11 = vst [vmem:[%s35_s1 + $0x10] sm:$0xff] %v4_v0 }

// kernel: tile.35
= control target key start
LH: loop header
LB: loop body
LE: loop exit
PB: predicated region body
PF: predicated region fallthrough
CT: control target
= control target key end

     0   :  { %s147_s10 = smov 68   ;;  %s148_s11 = smov 60   ;;  %vm3_vm0 = vcmask 31744   ;;  %vm9_vm1 = vcmask 589344   ;;  %vm15_vm2 = vcmask 556544   ;;  %vm21_vm3 = vcmask 523744   ;;  %s231_s0 = inlined_call_operand.vmem [shape: f32[18,4], index: 0, kind: input, shape index: {}]   ;;  %s232_s1 = inlined_call_operand.vmem [shape: f32[1,72], index: 1, kind: output, shape index: {}]  }
   0x1   :  { %v113_v0 = vld [vmem:[%s231_s0 + $0x11] sm:$0x1]   ;;  %v115_v1 = vld [vmem:[%s231_s0 + $0xf] sm:$0x1]   ;;  %v117_v2 = vld [vmem:[%s231_s0 + $0xd] sm:$0x1]  }
   0x2   :  { %7 = vrot.lane.b32.xlu0 %v113_v0, %s147_s10  ;;  %19 = vrot.lane.b32.xlu1 %v115_v1, %s148_s11  ;;  %s149_s14 = smov 52   ;;  %v114_v3 = vld [vmem:[%s231_s0 + $0x10] sm:$0x1]   ;;  %v116_v4 = vld [vmem:[%s231_s0 + $0xe] sm:$0x1]   ;;  %s150_s19 = smov 64  }
   0x3   :  { %31 = vrot.lane.b32.xlu2 %v117_v2, %s149_s14  ;;  %s151_s20 = smov 56   ;;  %v118_v5 = vld [vmem:[%s231_s0 + $0xc] sm:$0x1]   ;;  %s152_s23 = smov 48   ;;  %v119_v6 = vld [vmem:[%s231_s0 + $0xb] sm:$0x1]  }
   0x4   :  { %v120_v7 = vld [vmem:[%s231_s0 + $0xa] sm:$0x1]   ;;  %s153_s28 = smov 44   ;;  %s154_s29 = smov 40   ;;  %v121_v8 = vld [vmem:[%s231_s0 + $0x9] sm:$0x1]  }
   0x5   :  { %s155_s3 = smov 36   ;;  %v122_v9 = vld [vmem:[%s231_s0 + $0x8] sm:$0x1]   ;;  %v123_v10 = vld [vmem:[%s231_s0 + $0x7] sm:$0x1]   ;;  %s156_s8 = smov 32  }
   0x6   :  { %s157_s9 = smov 28   ;;  %v124_v11 = vld [vmem:[%s231_s0 + $0x6] sm:$0x1]   ;;  %s158_s12 = smov 24   ;;  %v125_v12 = vld [vmem:[%s231_s0 + $0x5] sm:$0x1]  }
   0x7   :  { %v126_v13 = vld [vmem:[%s231_s0 + $0x4] sm:$0x1]   ;;  %s159_s17 = smov 20   ;;  %s160_s18 = smov 16   ;;  %v127_v14 = vld [vmem:[%s231_s0 + $0x3] sm:$0x1]  }
   0x8   :  { %s161_s21 = smov 12   ;;  %v128_v15 = vld [vmem:[%s231_s0 + $0x2] sm:$0x1]   ;;  %v129_v16 = vld [vmem:[%s231_s0 + $0x1] sm:$0x1]   ;;  %s162_s26 = smov 8  }
   0x9   :  { %s163_s27 = smov 4   ;;  %v2_v17 = vld [vmem:[%s231_s0] sm:$0x1]   ;;  %vm27_vm4 = vcmask 490944   ;;  %vm33_vm5 = vcmask 458144   ;;  %vm39_vm6 = vcmask 425344  }
   0xa   :  { %13 = vrot.lane.b32.xlu0 %v114_v3, %s150_s19  ;;  %25 = vrot.lane.b32.xlu1 %v116_v4, %s151_s20  ;;  %4 = vst.msk [vmem:[#allocation0] sm:$0x1] %vm3_vm0, %v2_v17   ;;  %vm45_vm7 = vcmask 392544   ;;  %vm51_vm8 = vcmask 359744   ;;  %vm57_vm9 = vcmask 326944   ;;  %vm63_vm10 = vcmask 294144  }
   0xb   :  { %37 = vrot.lane.b32.xlu2 %v118_v5, %s152_s23  ;;  %vm69_vm11 = vcmask 261344   ;;  %vm75_vm12 = vcmask 228544   ;;  %vm81_vm13 = vcmask 195744   ;;  %vm87_vm14 = vcmask 162944  }
   0xc   :  { %vm93_vm15 = vcmask 130144   ;;  %vm99_vm0 = vcmask 97344  }
  0x12   :  { %43 = vrot.lane.b32.xlu0 %v119_v6, %s153_s28  ;;  %49 = vrot.lane.b32.xlu1 %v120_v7, %s154_s29 }
  0x13   :  { %55 = vrot.lane.b32.xlu2 %v121_v8, %s155_s3 }
  0x1a   :  { %61 = vrot.lane.b32.xlu0 %v122_v9, %s156_s8  ;;  %67 = vrot.lane.b32.xlu1 %v123_v10, %s157_s9 }
  0x1b   :  { %73 = vrot.lane.b32.xlu2 %v124_v11, %s158_s12 }
  0x22   :  { %79 = vrot.lane.b32.xlu0 %v125_v12, %s159_s17  ;;  %85 = vrot.lane.b32.xlu1 %v126_v13, %s160_s18 }
  0x23   :  { %91 = vrot.lane.b32.xlu2 %v127_v14, %s161_s21 }
  0x2a   :  { %97 = vrot.lane.b32.xlu0 %v128_v15, %s162_s26  ;;  %103 = vrot.lane.b32.xlu1 %v129_v16, %s163_s27 }
  0x5d   :  { %v32_v18 = vpop.permute.xlu2 %31  }
  0x65   :  { %v38_v19 = vpop.permute.xlu2 %37  }
  0x6d   :  { %v56_v20 = vpop.permute.xlu2 %55  }
  0x74   :  { %v8_v21 = vpop.permute.xlu0 %7   ;;  %v20_v22 = vpop.permute.xlu1 %19  }
  0x75   :  { %10 = vst.msk [vmem:[#allocation0] sm:$0x1] %vm9_vm1, %v8_v21   ;;  %v74_v23 = vpop.permute.xlu2 %73   ;;  %vm105_vm1 = vcmask 64544  }
  0x7c   :  { %v14_v24 = vpop.permute.xlu0 %13   ;;  %v26_v25 = vpop.permute.xlu1 %25  }
  0x7d   :  { %16 = vst.msk [vmem:[#allocation0] sm:$0x1] %vm15_vm2, %v14_v24   ;;  %v92_v26 = vpop.permute.xlu2 %91  }
  0x7e   :  { %22 = vst.msk [vmem:[#allocation0] sm:$0x1] %vm21_vm3, %v20_v22  }
  0x7f   :  { %28 = vst.msk [vmem:[#allocation0] sm:$0x1] %vm27_vm4, %v26_v25  }
  0x80   :  { %34 = vst.msk [vmem:[#allocation0] sm:$0x1] %vm33_vm5, %v32_v18  }
  0x81   :  { %40 = vst.msk [vmem:[#allocation0] sm:$0x1] %vm39_vm6, %v38_v19  }
  0x84   :  { %v44_v27 = vpop.permute.xlu0 %43   ;;  %v50_v28 = vpop.permute.xlu1 %49  }
  0x85   :  { %46 = vst.msk [vmem:[#allocation0] sm:$0x1] %vm45_vm7, %v44_v27  }
  0x86   :  { %52 = vst.msk [vmem:[#allocation0] sm:$0x1] %vm51_vm8, %v50_v28  }
  0x87   :  { %58 = vst.msk [vmem:[#allocation0] sm:$0x1] %vm57_vm9, %v56_v20  }
  0x8c   :  { %v62_v29 = vpop.permute.xlu0 %61   ;;  %v68_v30 = vpop.permute.xlu1 %67  }
  0x8d   :  { %64 = vst.msk [vmem:[#allocation0] sm:$0x1] %vm63_vm10, %v62_v29  }
  0x8e   :  { %70 = vst.msk [vmem:[#allocation0] sm:$0x1] %vm69_vm11, %v68_v30  }
  0x8f   :  { %76 = vst.msk [vmem:[#allocation0] sm:$0x1] %vm75_vm12, %v74_v23  }
  0x94   :  { %v80_v31 = vpop.permute.xlu0 %79   ;;  %v86_v32 = vpop.permute.xlu1 %85  }
  0x95   :  { %82 = vst.msk [vmem:[#allocation0] sm:$0x1] %vm81_vm13, %v80_v31  }
  0x96   :  { %88 = vst.msk [vmem:[#allocation0] sm:$0x1] %vm87_vm14, %v86_v32  }
  0x97   :  { %94 = vst.msk [vmem:[#allocation0] sm:$0x1] %vm93_vm15, %v92_v26  }
  0x9c   :  { %v98_v33 = vpop.permute.xlu0 %97   ;;  %v104_v34 = vpop.permute.xlu1 %103  }
  0x9d   :  { %100 = vst.msk [vmem:[#allocation0] sm:$0x1] %vm99_vm0, %v98_v33  }
  0x9e   :  { %106 = vst.msk [vmem:[#allocation0] sm:$0x1] %vm105_vm1, %v104_v34  }
  0xa5   :  { %v109_v35 = vld [vmem:[#allocation0] sm:$0x1] }
  0xa6   :  { %112 = vst [vmem:[%s232_s1] sm:$0x1] %v109_v35 }

// kernel: hrgls_resunit_forward.1
= control target key start
LH: loop header
LB: loop body
LE: loop exit
PB: predicated region body
PF: predicated region fallthrough
CT: control target
= control target key end

     0   :  { %s1255_s17 = smov 0   ;;  %s1257_s18 = smov 0   ;;  %s1426_s0 = inlined_call_operand.vmem [shape: bf16[2,1,18,72], index: 0, kind: input, shape index: {}]   ;;  %s1427_s1 = inlined_call_operand.vmem [shape: f32[1,72], index: 1, kind: input, shape index: {}]   ;;  %s1428_s2 = inlined_call_operand.vmem [shape: f32[1,72], index: 2, kind: input, shape index: {}]   ;;  %s1429_s3 = inlined_call_operand.vmem [shape: bf16[72,72], index: 3, kind: input, shape index: {}]   ;;  %s1430_s4 = inlined_call_operand.vmem [shape: f32[1,72], index: 4, kind: input, shape index: {}]   ;;  %s1431_s5 = inlined_call_operand.vmem [shape: bf16[3,72,128], index: 5, kind: input, shape index: {}]   ;;  %s1432_s6 = inlined_call_operand.vmem [shape: f32[1,128], index: 6, kind: input, shape index: {}]   ;;  %s1433_s7 = inlined_call_operand.vmem [shape: bf16[128,128], index: 7, kind: input, shape index: {}]   ;;  %s1434_s8 = inlined_call_operand.vmem [shape: f32[1,128], index: 8, kind: input, shape index: {}]   ;;  %s1435_s9 = inlined_call_operand.vmem [shape: bf16[72,128], index: 9, kind: input, shape index: {}]   ;;  %s1436_s10 = inlined_call_operand.vmem [shape: f32[1,128], index: 10, kind: input, shape index: {}]   ;;  %s1437_s11 = inlined_call_operand.vmem [shape: f32[2,16,128], index: 11, kind: output, shape index: {}]  }
   0x1   :  { %s1259_s19 = smov 0  }
   0x2 LB: > { %s33_s20 = sadd.s32 1, %s1189_s18  ;;  %p965_p0 = scmp.ge.s32.totalorder %s1193_s19, 1  ;;  %s1193_s19 = sphi %s1259_s19, %s21_s19   ;;  %s1189_s18 = sphi %s1257_s18, %s1439_s18   ;;  %s1185_s17 = sphi %s1255_s17, %s1438_s17  }
   0x3   : > { %p35_p1 = scmp.ge.s32.totalorder %s33_s20, 2  ;;  %p357_p2 = scmp.lt.s32.totalorder %s1193_s19, 3 }
   0x5   : > { %s1441_s20 = smov (%p35_p1, %s33_s20), 0  ;;  %p358_p3 = pnand %p965_p0, %p357_p2 }
   0x6   : > { %p405_p4 = scmp.lt.s32.totalorder (!%p358_p3), %s1185_s17, 1 }
   0x7   : > { %361 = sbr.rel (%p358_p3) target bundleno = 482 (0x1e2), region = 64 }
   0xc   : > { %v530_v0 = vld [vmem:[%s1429_s3 + $0x20] sm:$0xf]  ;;  %vm482_vm0 = vcmask 1043456   ;;  %s1443_s17 = smov (!%p405_p4, %s1185_s17), 1  ;;  %v1115_v4 = vld [vmem:[%s1429_s3 + $0x18] sm:$0xff]  ;;  %vm431_vm1 = vcmask 588800  }
   0xd   : > { %v552_v1 = vunpack.c.l.b16 %v530_v0  ;;  %s1140_s23 = smul.u32 12, %s1443_s17  ;;  %vm434_vm2 = vcmask 582656   ;;  %v1114_v10 = vld [vmem:[%s1429_s3 + $0x10] sm:$0xff]  ;;  %v447_v11 = vld [vmem:[%s1435_s9 + $0x20] sm:$0xf]  ;;  %v1113_v13 = vld [vmem:[%s1429_s3 + $0x8] sm:$0xff] }
   0xe   : > { %v469_v12 = vunpack.c.l.b16 %v447_v11  ;;  %v1165_v14 = vld [vmem:[%s1427_s1] ss:$0 sm:$0xff]  ;;  %v1111_v19 = vld [vmem:[%s1435_s9 + $0x18] sm:$0xff]  ;;  %v1110_v36 = vld [vmem:[%s1435_s9 + $0x10] sm:$0xff] }
   0xf   : > { %v557_v2 = vpack.c.b16 %v552_v1, %v552_v1  ;;  %s413_s28 = scalar_lea.vmem %s1426_s0, %s1140_s23  ;;  %v1166_v16 = vld [vmem:[%s1428_s2] ss:$0 sm:$0xff]  ;;  %v1109_v39 = vld [vmem:[%s1435_s9 + $0x8] sm:$0xff]  ;;  %v1119_v40 = vld [vmem:[%s1431_s5 + $0x18] sm:$0xff] }
  0x10   : > { %v1137_v5 = vld [vmem:[%s413_s28] sm:$0xff]   ;;  %v427_v6 = vld [vmem:[%s413_s28 + $0x8] sm:$0x1]  ;;  %v474_v15 = vpack.c.b16 %v469_v12, %v469_v12  ;;  %v1118_v48 = vld [vmem:[%s1431_s5 + $0x10] sm:$0xff]  ;;  %s1107_s28 = sshll.u32 %s1443_s17, 4 }
  0x11   : > { %v569_v3 = vsel %vm482_vm0, %v557_v2, 0  ;;  %v1138_v7 = vunpack.c.l.bf16 %v1137_v5  ;;  %v1139_v8 = vunpack.c.h.bf16 %v1137_v5  ;;  %v430_v9 = vunpack.c.l.bf16 %v427_v6  ;;  %v1112_v20 = vld [vmem:[%s1429_s3] sm:$0xff]  ;;  %v1055_v42 = vld [vmem:[%s1431_s5 + $0x68] sm:$0xf]  ;;  %v1122_v57 = vld [vmem:[%s1431_s5 + $0x34] sm:$0xff]  ;;  %s422_s12 = scalar_lea.vmem %s1437_s11, %s1107_s28 }
  0x12   : > { %574 = vmatpush.bf16.msra.mxu1 %v569_v3  ;;  %v484_v17 = vsel %vm482_vm0, %v474_v15, 0  ;;  %v606_v34 = vld [vmem:[%s1431_s5 + $0x20] sm:$0xf]  ;;  %v1012_v41 = vld [vmem:[%s1431_s5 + $0x44] sm:$0xf]  ;;  %v744_v44 = vunpack.c.l.b16 %v1055_v42  ;;  %v1117_v55 = vld [vmem:[%s1431_s5 + $0x8] sm:$0xff] }
  0x13   : > { %432 = vst.msk [vmem:[#allocation2] sm:$0xff] %vm431_vm1, %v1138_v7  ;;  %489 = vmatpush.bf16.msra.mxu0 %v484_v17  ;;  %v684_v35 = vunpack.c.l.b16 %v606_v34  ;;  %v637_v43 = vunpack.c.l.b16 %v1012_v41  ;;  %v1108_v45 = vld [vmem:[%s1435_s9] sm:$0xff]  ;;  %v1126_v59 = vld [vmem:[%s1431_s5 + $0x58] sm:$0xff]  ;;  %v1121_v60 = vld [vmem:[%s1431_s5 + $0x2c] sm:$0xff] }
  0x14   : > { %433 = vst.msk [vmem:[#allocation2 + $0x8] sm:$0xff] %vm431_vm1, %v1139_v8  ;;  %v749_v47 = vpack.c.b16 %v744_v44, %v744_v44  ;;  %v1123_v54 = vld [vmem:[%s1431_s5 + $0x3c] sm:$0xff]  ;;  %v1125_v61 = vld [vmem:[%s1431_s5 + $0x50] sm:$0xff]  ;;  %v1120_v62 = vld [vmem:[%s1431_s5 + $0x24] sm:$0xff] }
  0x15   : > { %435 = vst.msk [vmem:[#allocation2 + $0x10] sm:$0x3] %vm434_vm2, %v430_v9  ;;  %v689_v37 = vpack.c.b16 %v684_v35, %v684_v35  ;;  %v642_v46 = vpack.c.b16 %v637_v43, %v637_v43  ;;  %v1127_v56 = vld [vmem:[%s1431_s5 + $0x60] sm:$0xff]  ;;  %v1124_v63 = vld [vmem:[%s1431_s5 + $0x48] sm:$0xff] }
  0x16   : > { %575 = vmatpush.bf16.msra.mxu1 %v1115_v4  ;;  %v758_v50 = vsel %vm482_vm0, %v749_v47, 0  ;;  %v1116_v58 = vld [vmem:[%s1431_s5] sm:$0xff] }
  0x17   : > { %490 = vmatpush.bf16.msra.mxu0 %v1111_v19  ;;  %v698_v38 = vsel %vm482_vm0, %v689_v37, 0  ;;  %v651_v49 = vsel %vm482_vm0, %v642_v46, 0  ;;  %v1167_v0 = vld [vmem:[%s1430_s4] ss:$0 sm:$0xff] }
  0x18   : > { %703 = vmatpush.bf16.msra.mxu3 %v698_v38  ;;  %656 = vmatpush.bf16.msra.mxu2 %v651_v49  ;;  %v1169_v35 = vld [vmem:[%s1432_s6] ss:$0 sm:$0xff] }
  0x19   : > { %v1168_v46 = vld [vmem:[%s1436_s10] ss:$0 sm:$0xff] }
  0x1a   : > { %576 = vmatpush.bf16.msra.mxu1 %v1114_v10  ;;  %v500_v18 = vld [vmem:[#allocation2] sm:$0xff] }
  0x1b   : > { %v501_v21 = vld [vmem:[#allocation2 + $0x8] sm:$0xff]  ;;  %v507_v22 = vmul.f32 %v1165_v14, %v500_v18  ;;  %491 = vmatpush.bf16.msra.mxu0 %v1110_v36  ;;  %v1170_v47 = vld [vmem:[%s1434_s8] ss:$0 sm:$0xff] }
  0x1c   : > { %v508_v23 = vmul.f32 %v1165_v14, %v501_v21  ;;  %v502_v28 = vld [vmem:[#allocation2 + $0x10] sm:$0x3]  ;;  %704 = vmatpush.bf16.msra.mxu3 %v1119_v40  ;;  %v436_v51 = vld [vmem:[#allocation2 + $0x1] sm:$0xff]  ;;  %657 = vmatpush.bf16.msra.mxu2 %v1123_v54 }
  0x1d   : > { %v514_v24 = vadd.f32 %v1166_v16, %v507_v22  ;;  %v509_v30 = vmul.f32 %v1165_v14, %v502_v28  ;;  %v437_v52 = vld [vmem:[#allocation2 + $0x9] sm:$0xff]  ;;  %v1128_v28 = vld [vmem:[%s1433_s7] sm:$0xff] }
  0x1e   : > { %577 = vmatpush.bf16.msra.mxu1 %v1113_v13  ;;  %v515_v25 = vadd.f32 %v1166_v16, %v508_v23  ;;  %v438_v53 = vpack.c.bf16 %v437_v52, %v436_v51  ;;  %v1134_v21 = vld [vmem:[%s1433_s7 + $0x30] sm:$0xff]  ;;  %v1133_v22 = vld [vmem:[%s1433_s7 + $0x28] sm:$0xff]  ;;  %v1132_v23 = vld [vmem:[%s1433_s7 + $0x20] sm:$0xff] }
  0x1f   : > { %v517_v26 = vmax.f32 %v514_v24, 0.0  ;;  %v516_v31 = vadd.f32 %v1166_v16, %v509_v30  ;;  %492 = vmatpush.bf16.msra.mxu0 %v1109_v39  ;;  %v1131_v24 = vld [vmem:[%s1433_s7 + $0x18] sm:$0xff] }
  0x20   : > { %v518_v27 = vmax.f32 %v515_v25, 0.0  ;;  %705 = vmatpush.bf16.msra.mxu3 %v1118_v48  ;;  %658 = vmatpush.bf16.msra.mxu2 %v1122_v57  ;;  %v1130_v25 = vld [vmem:[%s1433_s7 + $0x10] sm:$0xff] }
  0x21   : > { %v519_v32 = vmax.f32 %v516_v31, 0.0 }
  0x22   : > { %578 = vmatpush.bf16.msra.mxu1 %v1112_v20  ;;  %v520_v29 = vpack.c.bf16 %v518_v27, %v517_v26  ;;  %v1135_v20 = vld [vmem:[%s1433_s7 + $0x38] sm:$0xff]  ;;  %v1129_v26 = vld [vmem:[%s1433_s7 + $0x8] sm:$0xff] }
  0x23   : > { %v521_v33 = vpack.c.bf16 %v519_v32, %v519_v32  ;;  %493 = vmatpush.bf16.msra.mxu0 %v1108_v45 }
  0x24   : > { %706 = vmatpush.bf16.msra.mxu3 %v1117_v55  ;;  %659 = vmatpush.bf16.msra.mxu2 %v1121_v60 }
  0x25   : > { %1002 = vmatmul.msk.bf16.vlgmr.msra.gmra.mxu1 %vm431_vm1, %v520_v29 }
  0x26   : > { %985 = vmatmul.msk.bf16.vlgmr.msra.gmra.mxu0 %vm431_vm1, %v438_v53  ;;  %853 = vmatpush.bf16.msrb.mxu1 %v1135_v20 }
  0x27   : > { %763 = vmatpush.bf16.msrb.mxu0 %v758_v50 }
  0x28   : > { %707 = vmatpush.bf16.msra.mxu3 %v1116_v58  ;;  %660 = vmatpush.bf16.msra.mxu2 %v1120_v62 }
  0x2a   : > { %854 = vmatpush.bf16.msrb.mxu1 %v1134_v21 }
  0x2b   : > { %764 = vmatpush.bf16.msrb.mxu0 %v1127_v56 }
  0x2e   : > { %855 = vmatpush.bf16.msrb.mxu1 %v1133_v22 }
  0x2f   : > { %765 = vmatpush.bf16.msrb.mxu0 %v1126_v59 }
  0x32   : > { %856 = vmatpush.bf16.msrb.mxu1 %v1132_v23 }
  0x33   : > { %766 = vmatpush.bf16.msrb.mxu0 %v1125_v61 }
  0x35   : > { %1003 = vmatmul.msk.bf16.gmra.mxu1 %vm431_vm1, %v521_v33 }
  0x36   : > { %857 = vmatpush.bf16.msrb.mxu1 %v1131_v24 }
  0x37   : > { %767 = vmatpush.bf16.msrb.mxu0 %v1124_v63 }
  0x3a   : > { %858 = vmatpush.bf16.msrb.mxu1 %v1130_v25 }
  0x3e   : > { %859 = vmatpush.bf16.msrb.mxu1 %v1129_v26 }
  0x42   : > { %860 = vmatpush.bf16.msrb.mxu1 %v1128_v28 }
  0xa2   : > { %v580_v1 = vpop.f32.mrf.mxu1 }
  0xa3   : > { %v581_v2 = vadd.f32 %v1167_v0, %v580_v1  ;;  %v495_v27 = vpop.f32.mrf.mxu0 }
  0xa4   : > { %v496_v49 = vadd.f32 %v1168_v46, %v495_v27 }
  0xa5   : > { %v589_v3 = vmax.f32 %v581_v2, 0.0 }
  0xa7   : > { %592 = vst.msk [vmem:[#allocation3] sm:$0xff] %vm431_vm1, %v589_v3 }
  0xaa   : > { %v582_v4 = vpop.f32.mrf.mxu1 }
  0xab   : > { %v583_v5 = vadd.f32 %v1167_v0, %v582_v4  ;;  %v497_v29 = vpop.f32.mrf.mxu0 }
  0xac   : > { %v498_v53 = vadd.f32 %v1168_v46, %v497_v29 }
  0xad   : > { %v590_v6 = vmax.f32 %v583_v5, 0.0 }
  0xae   : > { %v595_v10 = vld [vmem:[#allocation3] sm:$0xff] }
  0xaf   : > { %593 = vst.msk [vmem:[#allocation3 + $0x8] sm:$0xff] %vm431_vm1, %v590_v6 }
  0xb2   : > { %v585_v7 = vpop.f32.mrf.mxu1 }
  0xb3   : > { %v586_v8 = vadd.f32 %v1167_v0, %v585_v7 }
  0xb5   : > { %v591_v9 = vmax.f32 %v586_v8, 0.0 }
  0xb6   : > { %v596_v11 = vld [vmem:[#allocation3 + $0x8] sm:$0xff] }
  0xb7   : > { %594 = vst.msk [vmem:[#allocation3 + $0x10] sm:$0x3] %vm434_vm2, %v591_v9  ;;  %v597_v12 = vpack.c.bf16 %v596_v11, %v595_v10  ;;  %v607_v14 = vld [vmem:[#allocation3 + $0x1] sm:$0xff] }
  0xb8   : > { %v714_v16 = vld [vmem:[#allocation3 + $0x2] sm:$0xff] }
  0xb9   : > { %1046 = vmatmul.msk.bf16.vlgmr.msra.gmra.mxu3 %vm431_vm1, %v597_v12 }
  0xba   : > { %v587_v13 = vpop.f32.mrf.mxu1 }
  0xbe   : > { %v608_v15 = vld [vmem:[#allocation3 + $0x9] sm:$0xff] }
  0xbf   : > { %v715_v17 = vld [vmem:[#allocation3 + $0xa] sm:$0xff]  ;;  %v609_v18 = vpack.c.bf16 %v608_v15, %v607_v14 }
  0xc0   : > { %v716_v19 = vpack.c.bf16 %v715_v17, %v714_v16 }
  0xc1   : > { %1029 = vmatmul.msk.bf16.vlgmr.msra.gmra.mxu2 %vm431_vm1, %v609_v18 }
  0xc2   : > { %1072 = vmatmul.msk.bf16.vlgmr.msrb.gmra.mxu0 %vm431_vm1, %v716_v19 }
 0x13c   : > { %v709_v30 = vpop.f32.mrf.mxu3 }
 0x13f   : > { %v769_v31 = vpop.f32.mrf.mxu0 }
 0x144   : > { %v662_v32 = vpop.f32.mrf.mxu2  ;;  %v711_v36 = vpop.f32.mrf.mxu3 }
 0x145   : > { %v710_v33 = vadd.f32 %v709_v30, %v662_v32 }
 0x147   : > { %v774_v34 = vadd.f32 %v769_v31, %v710_v33  ;;  %v771_v39 = vpop.f32.mrf.mxu0 }
 0x149   : > { %v780_v40 = vadd.f32 %v1169_v35, %v774_v34 }
 0x14b   : > { %v782_v43 = vmax.f32 %v780_v40, 0.0 }
 0x14c   : > { %v664_v37 = vpop.f32.mrf.mxu2 }
 0x14d   : > { %v712_v38 = vadd.f32 %v711_v36, %v664_v37 }
 0x14f   : > { %v775_v41 = vadd.f32 %v771_v39, %v712_v38 }
 0x151   : > { %v781_v42 = vadd.f32 %v1169_v35, %v775_v41 }
 0x153   : > { %v783_v44 = vmax.f32 %v781_v42, 0.0 }
 0x155   : > { %v784_v45 = vpack.c.bf16 %v783_v44, %v782_v43 }
 0x157   : > { %861 = vmatmul.bf16.vlgmr.msrb.gmra.mxu1 %v784_v45 }
 0x1d4   : > { %v862_v48 = vpop.f32.mrf.mxu1 }
 0x1d5   : > { %v863_v50 = vadd.f32 %v1170_v47, %v862_v48 }
 0x1d7   : > { %v867_v51 = vadd.f32 %v863_v50, %v496_v49 }
 0x1d9   : > { %869 = vst [vmem:[%s422_s12] sm:$0xff] %v867_v51 }
 0x1dc   : > { %v864_v52 = vpop.f32.mrf.mxu1 }
 0x1dd   : > { %v865_v54 = vadd.f32 %v1170_v47, %v864_v52 }
 0x1df   : > { %v868_v55 = vadd.f32 %v865_v54, %v498_v53 }
 0x1e1   : > { %870 = vst [vmem:[%s422_s12 + $0x8] sm:$0xff] %v868_v55 }
 0x1e2 PF: > { %s21_s19 = sadd.s32 1, %s1193_s19   ;;  %s1438_s17 = smov %s1189_s18 }
 0x1e3   : > { %p18_p5 = scmp.ge.s32.totalorder %s21_s19, 4   ;;  %s1439_s18 = smov %s1441_s20 }
 0x1e5   :  { %20 = sbr.rel (!%p18_p5) target bundleno = 2 (0x2), region = 96 }

</bundles_post_ra>
